<compile_context>
chip_gen: v6e
topology: v6e:2x2x1
jax: 0.10.0
libtpu: 0.0.40
codegen_flags: <defaults>
</compile_context>

<pallas_src>
import jax
import jax.numpy as jnp
from jax.experimental import pallas as pl
from jax.experimental.pallas import tpu as pltpu

IN_FEATURES = 4
OUT_FEATURES = 3


def nnet_kernel(xt_ref, w_ref, b_ref, o_ref):
    # xt_ref: (4, TB) f32   (x transposed: batch on the lane axis)
    # w_ref : (3, 4) f32    (PyTorch nn.Linear weight layout)
    # b_ref : (3, 1) f32
    # o_ref : (3, TB) f32   (softmax probs, class-major; transposed back outside)
    xt = xt_ref[...]
    w = w_ref[...]
    b = b_ref[...]

    # Linear: logits[c, :] = sum_k w[c, k] * x[:, k] + b[c]
    # 4 unrolled broadcast FMAs on full 128-lane vregs; MXU skipped on purpose
    # (a 4x3 GEMV would be >99% zero padding + push/pop latency).
    logits = b + w[:, 0:1] * xt[0:1, :]
    for k in range(1, IN_FEATURES):
        logits = logits + w[:, k:k + 1] * xt[k:k + 1, :]

    # Softmax over the 3 classes = elementwise VPU max/add across 3 sublane
    # rows (static slices); no cross-lane/XLU reduce needed.
    l0 = logits[0:1, :]
    l1 = logits[1:2, :]
    l2 = logits[2:3, :]
    m = jnp.maximum(jnp.maximum(l0, l1), l2)
    e0 = jnp.exp(l0 - m)
    e1 = jnp.exp(l1 - m)
    e2 = jnp.exp(l2 - m)
    # Exact divide (hidden behind HBM traffic) so rows sum to 1 exactly-ish;
    # the approx EUP reciprocal was the source of the failed row-sum check.
    inv = 1.0 / (e0 + e1 + e2)

    # Three unmasked lane-dense stores (TB is a multiple of 128).
    o_ref[0:1, :] = e0 * inv
    o_ref[1:2, :] = e1 * inv
    o_ref[2:3, :] = e2 * inv


def nnet_forward(x, weight, bias, *, tile_b=None):
    """x: (B, 4); weight: (3, 4) in PyTorch nn.Linear layout; bias: (3,)."""
    B = x.shape[0]
    # Lane-dense batch tile: multiple of 128 lanes, capped so per-step VMEM is
    # a few hundred KB (well under v7x's 64 MiB physical / 32 MiB scoped VMEM).
    if tile_b is None:
        tile_b = min(2048, pl.cdiv(B, 128) * 128)
    b_padded = pl.cdiv(B, tile_b) * tile_b

    # Wrapper-side relayout: batch -> lane (last) axis; pad to full tiles so
    # the final block never reads out of bounds.
    xt = x.T  # (4, B)
    if b_padded != B:
        xt = jnp.pad(xt, ((0, 0), (0, b_padded - B)))
    bias2d = bias.reshape(OUT_FEATURES, 1)

    # TODO(synk): optionally feed x/out as bf16 (keep f32 math in-kernel) for
    # ~1.3x at the HBM roofline on v6e/v7x; kept f32 here for exactness.
    out_t = pl.pallas_call(
        nnet_kernel,
        out_shape=jax.ShapeDtypeStruct((OUT_FEATURES, b_padded), jnp.float32),
        grid=(b_padded // tile_b,),
        in_specs=[
            # Batch tiles stream; W and bias use constant index maps so they
            # stay resident in VMEM across grid steps.
            pl.BlockSpec((IN_FEATURES, tile_b), lambda i: (0, i)),
            pl.BlockSpec((OUT_FEATURES, IN_FEATURES), lambda i: (0, 0)),
            pl.BlockSpec((OUT_FEATURES, 1), lambda i: (0, 0)),
        ],
        out_specs=pl.BlockSpec((OUT_FEATURES, tile_b), lambda i: (0, i)),
        compiler_params=pltpu.CompilerParams(
            dimension_semantics=("parallel",)),  # shards tiles across v7x's 2 TCs
    )(xt, weight, bias2d)

    # Back to the PyTorch output layout (B, 3).
    return out_t[:, :B].T


def _ref_forward(x, weight, bias):
    logits = x @ weight.T + bias
    return jax.nn.softmax(logits, axis=1)


if __name__ == "__main__":
    key = jax.random.PRNGKey(0)
    k_x, k_w, k_b = jax.random.split(key, 3)

    B = 8
    x = jax.random.normal(k_x, (B, IN_FEATURES), dtype=jnp.float32)

    # Deterministic parameter init mirroring nn.Linear's default:
    # U(-1/sqrt(in_features), 1/sqrt(in_features))
    bound = 1.0 / (IN_FEATURES ** 0.5)
    weight = jax.random.uniform(k_w, (OUT_FEATURES, IN_FEATURES),
                                minval=-bound, maxval=bound, dtype=jnp.float32)
    bias = jax.random.uniform(k_b, (OUT_FEATURES,),
                              minval=-bound, maxval=bound, dtype=jnp.float32)

    out = nnet_forward(x, weight, bias)
    out = jax.block_until_ready(out)

    ref = _ref_forward(x, weight, bias)
    assert out.shape == (B, OUT_FEATURES)
    assert jnp.allclose(out, ref, atol=1e-5, rtol=1e-5)
    # Exact divide in the kernel -> rows are true probabilities.
    assert jnp.allclose(jnp.sum(out, axis=1), jnp.ones((B,)), atol=1e-5)

    print("KERNEL_OK")
</pallas_src>

<mosaic_0001>
module attributes {stable_mosaic.version = 11 : i64} {
  func.func @nnet_kernel(%arg0: i32, %arg1: memref<4x128xf32, #tpu.memory_space<vmem>>, %arg2: memref<3x4xf32, #tpu.memory_space<vmem>>, %arg3: memref<3x1xf32, #tpu.memory_space<vmem>>, %arg4: memref<3x128xf32, #tpu.memory_space<vmem>>) attributes {dimension_semantics = [#tpu.dimension_semantics<parallel>], iteration_bounds = array<i64: 1>, scalar_prefetch = 0 : i64, scratch_operands = 0 : i64, tpu.core_type = #tpu.core_type<tc>, window_params = [{transform_indices = @transform_0, window_bounds = array<i64: 4, 128>}, {pipeline_mode = #tpu.pipeline_mode<synchronous>, transform_indices = @transform_1, window_bounds = array<i64: 3, 4>}, {pipeline_mode = #tpu.pipeline_mode<synchronous>, transform_indices = @transform_2, window_bounds = array<i64: 3, 1>}, {transform_indices = @transform_3, window_bounds = array<i64: 3, 128>}]} {
    %c0 = arith.constant 0 : index
    %c0_0 = arith.constant 0 : index
    %0 = vector.load %arg1[%c0, %c0_0] : memref<4x128xf32, #tpu.memory_space<vmem>>, vector<4x128xf32>
    %c0_1 = arith.constant 0 : index
    %c0_2 = arith.constant 0 : index
    %1 = vector.load %arg2[%c0_1, %c0_2] : memref<3x4xf32, #tpu.memory_space<vmem>>, vector<3x4xf32>
    %c0_3 = arith.constant 0 : index
    %c0_4 = arith.constant 0 : index
    %2 = vector.load %arg3[%c0_3, %c0_4] : memref<3x1xf32, #tpu.memory_space<vmem>>, vector<3x1xf32>
    %3 = vector.extract_strided_slice %1 {offsets = [0, 0], sizes = [3, 1], strides = [1, 1]} : vector<3x4xf32> to vector<3x1xf32>
    %4 = vector.extract_strided_slice %0 {offsets = [0, 0], sizes = [1, 128], strides = [1, 1]} : vector<4x128xf32> to vector<1x128xf32>
    %5 = vector.broadcast %3 : vector<3x1xf32> to vector<3x128xf32>
    %6 = vector.broadcast %4 : vector<1x128xf32> to vector<3x128xf32>
    %7 = arith.mulf %5, %6 : vector<3x128xf32>
    %8 = vector.broadcast %2 : vector<3x1xf32> to vector<3x128xf32>
    %9 = arith.addf %8, %7 : vector<3x128xf32>
    %10 = vector.extract_strided_slice %1 {offsets = [0, 1], sizes = [3, 1], strides = [1, 1]} : vector<3x4xf32> to vector<3x1xf32>
    %11 = vector.extract_strided_slice %0 {offsets = [1, 0], sizes = [1, 128], strides = [1, 1]} : vector<4x128xf32> to vector<1x128xf32>
    %12 = vector.broadcast %10 : vector<3x1xf32> to vector<3x128xf32>
    %13 = vector.broadcast %11 : vector<1x128xf32> to vector<3x128xf32>
    %14 = arith.mulf %12, %13 : vector<3x128xf32>
    %15 = arith.addf %9, %14 : vector<3x128xf32>
    %16 = vector.extract_strided_slice %1 {offsets = [0, 2], sizes = [3, 1], strides = [1, 1]} : vector<3x4xf32> to vector<3x1xf32>
    %17 = vector.extract_strided_slice %0 {offsets = [2, 0], sizes = [1, 128], strides = [1, 1]} : vector<4x128xf32> to vector<1x128xf32>
    %18 = vector.broadcast %16 : vector<3x1xf32> to vector<3x128xf32>
    %19 = vector.broadcast %17 : vector<1x128xf32> to vector<3x128xf32>
    %20 = arith.mulf %18, %19 : vector<3x128xf32>
    %21 = arith.addf %15, %20 : vector<3x128xf32>
    %22 = vector.extract_strided_slice %1 {offsets = [0, 3], sizes = [3, 1], strides = [1, 1]} : vector<3x4xf32> to vector<3x1xf32>
    %23 = vector.extract_strided_slice %0 {offsets = [3, 0], sizes = [1, 128], strides = [1, 1]} : vector<4x128xf32> to vector<1x128xf32>
    %24 = vector.broadcast %22 : vector<3x1xf32> to vector<3x128xf32>
    %25 = vector.broadcast %23 : vector<1x128xf32> to vector<3x128xf32>
    %26 = arith.mulf %24, %25 : vector<3x128xf32>
    %27 = arith.addf %21, %26 : vector<3x128xf32>
    %28 = vector.extract_strided_slice %27 {offsets = [0, 0], sizes = [1, 128], strides = [1, 1]} : vector<3x128xf32> to vector<1x128xf32>
    %29 = vector.extract_strided_slice %27 {offsets = [1, 0], sizes = [1, 128], strides = [1, 1]} : vector<3x128xf32> to vector<1x128xf32>
    %30 = vector.extract_strided_slice %27 {offsets = [2, 0], sizes = [1, 128], strides = [1, 1]} : vector<3x128xf32> to vector<1x128xf32>
    %31 = arith.maximumf %28, %29 : vector<1x128xf32>
    %32 = arith.maximumf %31, %30 : vector<1x128xf32>
    %33 = arith.subf %28, %32 : vector<1x128xf32>
    %34 = math.exp %33 : vector<1x128xf32>
    %35 = arith.subf %29, %32 : vector<1x128xf32>
    %36 = math.exp %35 : vector<1x128xf32>
    %37 = arith.subf %30, %32 : vector<1x128xf32>
    %38 = math.exp %37 : vector<1x128xf32>
    %39 = arith.addf %34, %36 : vector<1x128xf32>
    %40 = arith.addf %39, %38 : vector<1x128xf32>
    %cst = arith.constant 1.000000e+00 : f32
    %41 = vector.broadcast %cst : f32 to vector<1x128xf32>
    %42 = arith.divf %41, %40 : vector<1x128xf32>
    %43 = arith.mulf %34, %42 : vector<1x128xf32>
    %c0_5 = arith.constant 0 : index
    %c0_6 = arith.constant 0 : index
    %44 = vector.load %arg4[%c0_5, %c0_6] : memref<3x128xf32, #tpu.memory_space<vmem>>, vector<1x128xf32>
    tpu.vector_store %arg4[%c0_5, %c0_6], %43 {strides = array<i32>} : memref<3x128xf32, #tpu.memory_space<vmem>>, vector<1x128xf32>,
    %45 = arith.mulf %36, %42 : vector<1x128xf32>
    %c1 = arith.constant 1 : index
    %c0_7 = arith.constant 0 : index
    %46 = vector.load %arg4[%c1, %c0_7] : memref<3x128xf32, #tpu.memory_space<vmem>>, vector<1x128xf32>
    tpu.vector_store %arg4[%c1, %c0_7], %45 {strides = array<i32>} : memref<3x128xf32, #tpu.memory_space<vmem>>, vector<1x128xf32>,
    %47 = arith.mulf %38, %42 : vector<1x128xf32>
    %c2 = arith.constant 2 : index
    %c0_8 = arith.constant 0 : index
    %48 = vector.load %arg4[%c2, %c0_8] : memref<3x128xf32, #tpu.memory_space<vmem>>, vector<1x128xf32>
    tpu.vector_store %arg4[%c2, %c0_8], %47 {strides = array<i32>} : memref<3x128xf32, #tpu.memory_space<vmem>>, vector<1x128xf32>,
    return
  }
  func.func @transform_0(%arg0: i32) -> (i32, i32) {
    %c0_i32 = arith.constant 0 : i32
    %c0_i32_0 = arith.constant 0 : i32
    return %c0_i32, %arg0 : i32, i32
  }
  func.func @transform_1(%arg0: i32) -> (i32, i32) {
    %c0_i32 = arith.constant 0 : i32
    %c0_i32_0 = arith.constant 0 : i32
    %c0_i32_1 = arith.constant 0 : i32
    return %c0_i32, %c0_i32_0 : i32, i32
  }
  func.func @transform_2(%arg0: i32) -> (i32, i32) {
    %c0_i32 = arith.constant 0 : i32
    %c0_i32_0 = arith.constant 0 : i32
    %c0_i32_1 = arith.constant 0 : i32
    return %c0_i32, %c0_i32_0 : i32, i32
  }
  func.func @transform_3(%arg0: i32) -> (i32, i32) {
    %c0_i32 = arith.constant 0 : i32
    %c0_i32_0 = arith.constant 0 : i32
    return %c0_i32, %arg0 : i32, i32
  }
}

</mosaic_0001>

<bundles_post_ra>
// kernel: tpu_custom_call.1
= control target key start
LH: loop header
LB: loop body
LE: loop exit
PB: predicated region body
PF: predicated region fallthrough
CT: control target
= control target key end

     0   :  { %8 = vsyncpa [#allocation3], 0  ;;  %s233_s0 = inlined_call_operand.vmem [shape: f32[4,128], index: 0, kind: input, shape index: {}]   ;;  %s234_s1 = inlined_call_operand.hbm [shape: f32[3,4], index: 1, kind: input, shape index: {}]   ;;  %s235_s2 = inlined_call_operand.vmem [shape: f32[3,1], index: 2, kind: input, shape index: {}]   ;;  %s236_s3 = inlined_call_operand.hbm [shape: f32[3,128], index: 3, kind: output, shape index: {}]  }
   0x1   :  { %9 = vsyncpa [#allocation4], 0  ;;  %s195_s12 = smov [#allocation2]  }
   0x2   :  { %s18_s13 = sshll.u32 %s195_s12, 4  ;;  %s19_s13 = int_to_ptr.vmem [resolvable:$true] %s18_s13 }
   0x3   :  { %s159_s14 = scalar_lea.vmem %s19_s13, 64  ;;  %p164_p1 = scmp.lt.s32.totalorder %s19_s13, %s19_s13 }
   0x4   :  { %p160_p0 = scmp.ne.s32.totalorder %s19_s13, %s159_s14  ;;  %p165_p2 = scmp.lt.s32.totalorder %s159_s14, %s159_s14 }
   0x6   :  { %p166_p3 = por %p165_p2, %p164_p1 }
   0x8   :  { %p167_p4 = pnand %p166_p3, %p160_p0 }
   0xa   :  { %170 = shalt.err (!%p167_p4)
}
   0xb   :  { %21 = dma.hbm_to_vmem [thread:$0]  %s234_s1, 64, %s19_s13, [#allocation3]  }
   0xc   :  { %191 = dma.done.wait [#allocation3], 64  }
   0xd   :  { %192 = vsyncadd [#allocation3], 4294967232  ;;  %v196_v0 = vmov 0   ;;  %v197_v1 = vmov 1   ;;  %v28_v2 = vld [vmem:[#allocation2] sm:$0x7]  ;;  %v35_v6 = vlaneseq }
   0xe   :  { %139 = vset.pattern.permute.xlu0 %v196_v0  ;;  %140 = vset.pattern.permute.xlu1 %v197_v1  ;;  %v29_v3 = vld [vmem:[%s235_s2] sm:$0x7]  ;;  %v198_v4 = vmov 2   ;;  %v199_v5 = vmov 3  }
   0xf   :  { %32 = vperm.xlu0 %139, %v28_v2   ;;  %47 = vperm.xlu1 %140, %v28_v2   ;;  %v36_v7 = vshrl.u32 %v35_v6, 7  ;;  %v27_v9 = vld [vmem:[%s233_s0] sm:$0xf]  ;;  %s200_s0 = smov [#allocation5]  }
  0x10   :  { %s124_s2 = sshll.u32 %s200_s0, 4  ;;  %s125_s2 = int_to_ptr.vmem [resolvable:$true] %s124_s2 }
  0x11   :  { %v37_v8 = vsub.s32 0, %v36_v7  ;;  %v52_v10 = vsub.s32 1, %v36_v7  ;;  %v62_v11 = vsub.s32 2, %v36_v7  ;;  %v72_v17 = vsub.s32 3, %v36_v7  ;;  %s171_s20 = scalar_lea.vmem %s125_s2, 64  ;;  %p176_p6 = scmp.lt.s32.totalorder %s125_s2, %s125_s2 }
  0x12   :  { %p172_p5 = scmp.ne.s32.totalorder %s125_s2, %s171_s20  ;;  %p177_p7 = scmp.lt.s32.totalorder %s171_s20, %s171_s20 }
  0x13   :  { %42 = vperm.xlu0 %139, %v29_v3   ;;  %141 = vset.pattern.permute.xlu1 %v198_v4  ;;  %v38_v12 = vrot.slane %v27_v9, %v37_v8  ;;  %v53_v15 = vrot.slane %v27_v9, %v52_v10  ;;  %v63_v16 = vrot.slane %v27_v9, %v62_v11 }
  0x14   :  { %57 = vperm.xlu1 %141, %v28_v2   ;;  %v73_v24 = vrot.slane %v27_v9, %v72_v17  ;;  %p178_p8 = por %p177_p7, %p176_p6 }
  0x16   :  { %p179_p9 = pnand %p178_p8, %p172_p5 }
  0x17   :  { %142 = vset.pattern.permute.xlu0 %v199_v5 }
  0x18   :  { %67 = vperm.xlu0 %142, %v28_v2  }
  0x8a   :  { %v33_v13 = vpop.permute.xlu0 %32  ;;  %v48_v14 = vpop.permute.xlu1 %47 }
  0x8b   :  { %v39_v18 = vmul.f32 %v38_v12, %v33_v13  ;;  %v54_v20 = vmul.f32 %v53_v15, %v48_v14 }
  0x8e   :  { %v43_v19 = vpop.permute.xlu0 %42 }
  0x8f   :  { %v45_v21 = vadd.f32 %v43_v19, %v39_v18  ;;  %v58_v22 = vpop.permute.xlu1 %57 }
  0x90   :  { %v64_v23 = vmul.f32 %v63_v16, %v58_v22 }
  0x91   :  { %v55_v25 = vadd.f32 %v54_v20, %v45_v21 }
  0x93   :  { %v65_v26 = vadd.f32 %v64_v23, %v55_v25  ;;  %v68_v27 = vpop.permute.xlu0 %67 }
  0x94   :  { %v74_v28 = vmul.f32 %v73_v24, %v68_v27 }
  0x96   :  { %v75_v29 = vadd.f32 %v74_v28, %v65_v26 }
  0x98   :  { %v77_v30 = vrot.slane %v75_v29, 1  ;;  %v80_v32 = vrot.slane %v75_v29, 2 }
  0x9a   :  { %v79_v31 = vmax.f32 %v75_v29, %v77_v30 }
  0x9c   :  { %v82_v33 = vmax.f32 %v79_v31, %v80_v32 }
  0x9e   :  { %v83_v34 = vsub.f32 %v75_v29, %v82_v33  ;;  %v87_v35 = vrot.slane %v82_v33, 7  ;;  %v92_v36 = vrot.slane %v82_v33, 6 }
  0xa0   :  { %v89_v37 = vsub.f32 %v75_v29, %v87_v35  ;;  %v94_v38 = vsub.f32 %v75_v29, %v92_v36  ;;  %v84_v39 = vmul.f32 1.442695, %v83_v34 }
  0xa2   :  { %v90_v40 = vmul.f32 1.442695, %v89_v37  ;;  %v95_v41 = vmul.f32 1.442695, %v94_v38 }
  0xa4   :  { %143 = vpow2.f32 %v90_v40 }
  0xa5   :  { %145 = vpow2.f32 %v95_v41 }
  0xa6   :  { %147 = vpow2.f32 %v84_v39 }
  0xb1   :  { %v144_v42 = vpop.eup %143 }
  0xb2   :  { %v146_v43 = vpop.eup %145  ;;  %v98_v44 = vrot.slane %v144_v42, 1 }
  0xb3   :  { %v148_v45 = vpop.eup %147  ;;  %v102_v47 = vrot.slane %v146_v43, 2 }
  0xb4   :  { %v100_v46 = vadd.f32 %v148_v45, %v98_v44 }
  0xb6   :  { %v104_v48 = vadd.f32 %v102_v47, %v100_v46 }
  0xb8   :  { %149 = vrcp.f32 %v104_v48 }
  0xc5   :  { %v150_v49 = vpop.eup %149 }
  0xc6   :  { %v107_v50 = vmul.f32 %v150_v49, %v148_v45  ;;  %v110_v51 = vrot.slane %v150_v49, 7  ;;  %v114_v52 = vrot.slane %v150_v49, 6 }
  0xc8   :  { %108 = vst [vmem:[#allocation5] sm:$0x1] %v107_v50  ;;  %v112_v53 = vmul.f32 %v144_v42, %v110_v51  ;;  %v116_v54 = vmul.f32 %v146_v43, %v114_v52 }
  0xca   :  { %113 = vst [vmem:[#allocation5] sm:$0x2] %v112_v53  ;;  %117 = vst [vmem:[#allocation5] sm:$0x4] %v116_v54 }
  0xcb   :  { %182 = shalt.err (!%p179_p9)
}
  0xcc   :  { %127 = dma.vmem_to_hbm [thread:$0]  %s125_s2, 64, %s236_s3, [#allocation4]  }
  0xcd   :  { %193 = dma.done.wait [#allocation4], 64  }
  0xce   :  { %194 = vsyncadd [#allocation4], 4294967232 }
  0xcf   :  { %131 = vsyncpa [#allocation3], 1 }
  0xd0   :  { %132 = vsyncpa [#allocation4], 1 }

</bundles_post_ra>
